<compile_context>
chip_gen: v5e
topology: v5e:2x2
jax: 0.10.0
libtpu: 0.0.40
codegen_flags: <defaults>
</compile_context>

<pallas_src>
import functools
import math

import jax
import jax.numpy as jnp
from jax.experimental import pallas as pl
from jax.experimental.pallas import tpu as pltpu


def _round_up(v, m):
    return ((v + m - 1) // m) * m


def _mha_kernel(x_ref, wqkv_ref, bqkv_ref, wo_ref, bo_ref, o_ref, *,
                num_heads, head_dim, compute_dtype, approx_recip):
    """Fused MHA forward for one batch-block.

    x_ref:    (B_blk, S, Ein_pad)  activations, lane-padded with zeros
    wqkv_ref: (Ein_pad, 3E)        dense QKV weight, columns packed
                                   [q heads | k heads | v heads] head-major,
                                   1/sqrt(Dh) folded into the q columns
    bqkv_ref: (1, 3E)              matching bias (f32, scale folded into q)
    wo_ref:   (Kpad, Ep)           dense o_proj weight, rows head-major,
                                   zero-padded rows/cols to lane multiples
    bo_ref:   (1, Ep)              output bias (f32)
    o_ref:    (B_blk, S, Ep)
    """
    b_blk, s, ein = x_ref.shape
    h, dh = num_heads, head_dim
    e = h * dh
    n = b_blk * s
    ep = o_ref.shape[-1]
    kpad = wo_ref.shape[0]

    # ---- QKV projection: ONE dense lane-padded MXU matmul ------------------
    x2 = x_ref[...].reshape(n, ein).astype(compute_dtype)          # (N, Ein)
    qkv = jnp.dot(x2, wqkv_ref[...],
                  preferred_element_type=jnp.float32)              # (N, 3E)
    qkv = qkv + bqkv_ref[...]                                      # f32

    # Split (kind, head) out of the lane dim and move heads into the leading
    # batch dim.  Static lane slices + leading-dim stack only (no s<->h
    # transpose), so this lowers to cheap relayout ops.
    def heads(kind):                                               # -> (H*B, S, Dh)
        off = kind * e
        cols = [qkv[:, off + i * dh: off + (i + 1) * dh].reshape(b_blk, s, dh)
                for i in range(h)]
        t = jnp.stack(cols, axis=0)                                # (H, B, S, Dh)
        return t.reshape(h * b_blk, s, dh).astype(compute_dtype)

    q, k, v = heads(0), heads(1), heads(2)

    # ---- attention (mask=None path); softmax math in f32 -------------------
    logits = jnp.einsum('bqd,bkd->bqk', q, k,
                        preferred_element_type=jnp.float32)        # (HB, S, S)
    m = jnp.max(logits, axis=-1, keepdims=True)
    p = jnp.exp(logits - m)                                        # unnormalized
    denom = jnp.sum(p, axis=-1, keepdims=True)                     # (HB, S, 1)
    vals = jnp.einsum('bqk,bkd->bqd', p.astype(compute_dtype), v,
                      preferred_element_type=jnp.float32)          # (HB, S, Dh)
    # Normalize AFTER the PV matmul: S/Dh x fewer VPU multiplies; reciprocal
    # rides the EUP slot.
    vals = vals * pl.reciprocal(denom, approx=approx_recip)

    # ---- merge heads back into lanes (head-major, zero lane-padded) --------
    vals4 = vals.reshape(h, b_blk, s, dh).astype(compute_dtype)
    parts = [vals4[i] for i in range(h)]                           # (B, S, Dh) each
    if kpad > e:
        parts.append(jnp.zeros((b_blk, s, kpad - e), compute_dtype))
    merged = jnp.concatenate(parts, axis=-1).reshape(n, kpad)      # (N, Kpad)

    # ---- output projection: ONE dense matmul (head-sum inside the MXU) -----
    o = jnp.dot(merged, wo_ref[...],
                preferred_element_type=jnp.float32) + bo_ref[...]  # (N, Ep)
    o_ref[...] = o.reshape(b_blk, s, ep).astype(o_ref.dtype)


def multihead_attention(x, w_qkv, b_qkv, w_o, b_o, *, num_heads,
                        batch_blocks=None, use_bf16_mxu=True,
                        approx_recip=False):
    """x: (B, S, E) f32.  w_qkv: (3E, E), b_qkv: (3E,), w_o: (E, E), b_o: (E,)
    (PyTorch nn.Linear conventions, interleaved per-head q|k|v layout of this
    repo's MultiheadAttention -- NOT torch.nn.MultiheadAttention's in_proj).

    batch_blocks=None -> 2 when B is even (>=2 grid steps; both TensorCores
    on v7x), else 1.  For big B, pick batch_blocks so each step keeps
    N = (B/batch_blocks)*S >= 256 (v6e/v7x MXU) while giving >=2 steps.
    approx_recip=True opts in to the EUP approximate reciprocal."""
    B, S, E = x.shape
    H = num_heads
    assert E % H == 0, "embed_dim must be divisible by num_heads"
    Dh = E // H
    if batch_blocks is None:
        batch_blocks = 2 if (B >= 2 and B % 2 == 0) else 1
    assert B % batch_blocks == 0
    B_blk = B // batch_blocks
    compute_dtype = jnp.bfloat16 if use_bf16_mxu else jnp.float32
    scale = 1.0 / math.sqrt(Dh)

    # ---- wrapper-side layout plumbing (free, runs in plain XLA) ------------
    Ein_p = _round_up(E, 128)     # QKV contraction dim (lane-padded)
    Kpad = _round_up(E, 128)      # o_proj contraction dim (lane-padded)
    Ep = _round_up(E, 128)        # output lane dim (lane-padded)

    # PyTorch layout: qkv column j -> head = j // (3*Dh), kind = (j//Dh) % 3.
    # Repack columns as [q heads | k heads | v heads] (kind-major, head-major
    # within kind) so in-kernel slicing is on contiguous lane ranges.
    w4 = w_qkv.reshape(H, 3, Dh, E)                    # (head, kind, dh, e_in)
    w4 = jnp.transpose(w4, (1, 0, 2, 3))               # (kind, head, dh, e_in)
    wqkv2d = jnp.transpose(w4.reshape(3 * E, E), (1, 0))   # (E, 3E)
    col_scale = jnp.concatenate([jnp.full((E,), scale, jnp.float32),
                                 jnp.ones((2 * E,), jnp.float32)])
    wqkv2d = wqkv2d * col_scale[None, :]               # fold 1/sqrt(Dh) into q
    wqkv2d = jnp.pad(wqkv2d, ((0, Ein_p - E), (0, 0))).astype(compute_dtype)

    b4 = jnp.transpose(b_qkv.reshape(H, 3, Dh), (1, 0, 2)).reshape(1, 3 * E)
    bqkv2d = (b4 * col_scale[None, :]).astype(jnp.float32)

    # o_proj: o = vals @ w_o.T + b_o with vals columns in head-major order.
    wo2d = jnp.pad(jnp.transpose(w_o, (1, 0)),
                   ((0, Kpad - E), (0, Ep - E))).astype(compute_dtype)
    bo2 = jnp.pad(b_o, (0, Ep - E)).reshape(1, Ep).astype(jnp.float32)

    xp = jnp.pad(x, ((0, 0), (0, 0), (0, Ein_p - E)))  # lane-dense input

    kernel = functools.partial(_mha_kernel, num_heads=H, head_dim=Dh,
                               compute_dtype=compute_dtype,
                               approx_recip=approx_recip)

    out = pl.pallas_call(
        kernel,
        out_shape=jax.ShapeDtypeStruct((B, S, Ep), x.dtype),
        grid_spec=pltpu.PrefetchScalarGridSpec(
            num_scalar_prefetch=0,
            grid=(batch_blocks,),
            in_specs=[
                pl.BlockSpec((B_blk, S, Ein_p), lambda i: (i, 0, 0)),
                # Constant index_map -> weights/biases stay VMEM-resident
                # across grid steps (tiny here; see TODO for Buffered(1)).
                pl.BlockSpec((Ein_p, 3 * E), lambda i: (0, 0)),
                pl.BlockSpec((1, 3 * E), lambda i: (0, 0)),
                pl.BlockSpec((Kpad, Ep), lambda i: (0, 0)),
                pl.BlockSpec((1, Ep), lambda i: (0, 0)),
            ],
            out_specs=pl.BlockSpec((B_blk, S, Ep), lambda i: (i, 0, 0)),
        ),
        compiler_params=pltpu.CompilerParams(
            dimension_semantics=("parallel",),
            vmem_limit_bytes=48 * 1024 * 1024),
    )(xp, wqkv2d, bqkv2d, wo2d, bo2)

    return out[:, :, :E] if Ep != E else out


def _xavier_uniform(key, shape):
    # nn.init.xavier_uniform_ for a Linear weight of shape (out, in)
    fan_out, fan_in = shape
    bound = math.sqrt(6.0 / (fan_in + fan_out))
    return jax.random.uniform(key, shape, jnp.float32, -bound, bound)


def _reference(x, w_qkv, b_qkv, w_o, b_o, num_heads):
    # pure-JAX f32 re-implementation of the PyTorch forward
    B, S, E = x.shape
    Dh = E // num_heads
    qkv = jnp.einsum("bse,oe->bso", x, w_qkv) + b_qkv              # (B,S,3E)
    qkv = qkv.reshape(B, S, num_heads, 3 * Dh).transpose(0, 2, 1, 3)
    q, k, v = jnp.split(qkv, 3, axis=-1)
    logits = jnp.einsum("bhqd,bhkd->bhqk", q, k) / math.sqrt(Dh)
    attn = jax.nn.softmax(logits, axis=-1)
    vals = jnp.einsum("bhqk,bhkd->bhqd", attn, v)
    vals = vals.transpose(0, 2, 1, 3).reshape(B, S, E)
    return jnp.einsum("bse,oe->bso", vals, w_o) + b_o


if __name__ == "__main__":
    # small shapes consistent with the module: input_dim == embed_dim
    B, S, E, H = 2, 8, 32, 4

    key = jax.random.PRNGKey(0)
    k_x, k_wqkv, k_wo, k_bqkv, k_bo = jax.random.split(key, 5)

    x = jax.random.normal(k_x, (B, S, E), jnp.float32)
    w_qkv = _xavier_uniform(k_wqkv, (3 * E, E))        # nn.Linear(E, 3E).weight
    w_o = _xavier_uniform(k_wo, (E, E))                # nn.Linear(E, E).weight
    # The module zero-inits biases; use small non-zero biases here so the
    # bias-add path is actually exercised.
    b_qkv = 0.1 * jax.random.normal(k_bqkv, (3 * E,), jnp.float32)
    b_o = 0.1 * jax.random.normal(k_bo, (E,), jnp.float32)

    ref = _reference(x, w_qkv, b_qkv, w_o, b_o, H)

    # exact f32 path (tight tolerance)
    out_f32 = jax.block_until_ready(
        multihead_attention(x, w_qkv, b_qkv, w_o, b_o, num_heads=H,
                            use_bf16_mxu=False))
    assert jnp.allclose(out_f32, ref, atol=1e-5, rtol=1e-5), "f32 mismatch"

    # default fast path: bf16 MXU operands + explicit approx reciprocal
    # (f32 softmax, 2-step 'parallel' grid -> both TensorCores on v7x)
    out_fast = jax.block_until_ready(
        multihead_attention(x, w_qkv, b_qkv, w_o, b_o, num_heads=H,
                            approx_recip=True))
    assert jnp.allclose(out_fast, ref, atol=5e-2, rtol=5e-2), "bf16 mismatch"

    # fully-folded single grid-step path (exact reciprocal, bf16 MXU)
    out_1blk = jax.block_until_ready(
        multihead_attention(x, w_qkv, b_qkv, w_o, b_o, num_heads=H,
                            batch_blocks=1))
    assert jnp.allclose(out_1blk, ref, atol=5e-2, rtol=5e-2), "1-block mismatch"

    print("KERNEL_OK")
</pallas_src>

<mosaic_0001>
module attributes {stable_mosaic.version = 11 : i64} {
  func.func @_mha_kernel(%arg0: i32, %arg1: memref<1x8x128xf32, #tpu.memory_space<vmem>>, %arg2: memref<128x96xf32, #tpu.memory_space<vmem>>, %arg3: memref<1x96xf32, #tpu.memory_space<vmem>>, %arg4: memref<128x128xf32, #tpu.memory_space<vmem>>, %arg5: memref<1x128xf32, #tpu.memory_space<vmem>>, %arg6: memref<1x8x128xf32, #tpu.memory_space<vmem>>) attributes {dimension_semantics = [#tpu.dimension_semantics<parallel>], iteration_bounds = array<i64: 2>, scalar_prefetch = 0 : i64, scratch_operands = 0 : i64, tpu.core_type = #tpu.core_type<tc>, window_params = [{transform_indices = @transform_0, window_bounds = array<i64: 1, 8, 128>}, {pipeline_mode = #tpu.pipeline_mode<synchronous>, transform_indices = @transform_1, window_bounds = array<i64: 128, 96>}, {pipeline_mode = #tpu.pipeline_mode<synchronous>, transform_indices = @transform_2, window_bounds = array<i64: 1, 96>}, {pipeline_mode = #tpu.pipeline_mode<synchronous>, transform_indices = @transform_3, window_bounds = array<i64: 128, 128>}, {pipeline_mode = #tpu.pipeline_mode<synchronous>, transform_indices = @transform_4, window_bounds = array<i64: 1, 128>}, {transform_indices = @transform_5, window_bounds = array<i64: 1, 8, 128>}]} {
    %c0 = arith.constant 0 : index
    %c0_0 = arith.constant 0 : index
    %c0_1 = arith.constant 0 : index
    %0 = vector.load %arg1[%c0, %c0_0, %c0_1] : memref<1x8x128xf32, #tpu.memory_space<vmem>>, vector<1x8x128xf32>
    %1 = vector.shape_cast %0 : vector<1x8x128xf32> to vector<8x128xf32>
    %c0_2 = arith.constant 0 : index
    %c0_3 = arith.constant 0 : index
    %2 = vector.load %arg2[%c0_2, %c0_3] : memref<128x96xf32, #tpu.memory_space<vmem>>, vector<128x96xf32>
    %cst = arith.constant dense<0.000000e+00> : vector<8x96xf32>
    %3 = tpu.matmul %1, %2, %cst {dimension_numbers = #tpu.dot_dimension_numbers<[1], [0], [0], [1], [0, 0, 1, 1], [], []>} : vector<8x128xf32>, vector<128x96xf32>, vector<8x96xf32> -> vector<8x96xf32>
    %c0_4 = arith.constant 0 : index
    %c0_5 = arith.constant 0 : index
    %4 = vector.load %arg3[%c0_4, %c0_5] : memref<1x96xf32, #tpu.memory_space<vmem>>, vector<1x96xf32>
    %5 = vector.broadcast %4 : vector<1x96xf32> to vector<8x96xf32>
    %6 = arith.addf %3, %5 : vector<8x96xf32>
    %7 = vector.extract_strided_slice %6 {offsets = [0, 0], sizes = [8, 8], strides = [1, 1]} : vector<8x96xf32> to vector<8x8xf32>
    %8 = vector.shape_cast %7 : vector<8x8xf32> to vector<1x8x8xf32>
    %9 = vector.extract_strided_slice %6 {offsets = [0, 8], sizes = [8, 8], strides = [1, 1]} : vector<8x96xf32> to vector<8x8xf32>
    %10 = vector.shape_cast %9 : vector<8x8xf32> to vector<1x8x8xf32>
    %11 = vector.extract_strided_slice %6 {offsets = [0, 16], sizes = [8, 8], strides = [1, 1]} : vector<8x96xf32> to vector<8x8xf32>
    %12 = vector.shape_cast %11 : vector<8x8xf32> to vector<1x8x8xf32>
    %13 = vector.extract_strided_slice %6 {offsets = [0, 24], sizes = [8, 8], strides = [1, 1]} : vector<8x96xf32> to vector<8x8xf32>
    %14 = vector.shape_cast %13 : vector<8x8xf32> to vector<1x8x8xf32>
    %15 = vector.shape_cast %8 : vector<1x8x8xf32> to vector<1x1x8x8xf32>
    %16 = vector.shape_cast %10 : vector<1x8x8xf32> to vector<1x1x8x8xf32>
    %17 = vector.shape_cast %12 : vector<1x8x8xf32> to vector<1x1x8x8xf32>
    %18 = vector.shape_cast %14 : vector<1x8x8xf32> to vector<1x1x8x8xf32>
    %19 = tpu.concatenate %15, %16, %17, %18 in 0 : vector<1x1x8x8xf32>, vector<1x1x8x8xf32>, vector<1x1x8x8xf32>, vector<1x1x8x8xf32> -> vector<4x1x8x8xf32>
    %20 = vector.shape_cast %19 : vector<4x1x8x8xf32> to vector<4x8x8xf32>
    %21 = vector.extract_strided_slice %6 {offsets = [0, 32], sizes = [8, 8], strides = [1, 1]} : vector<8x96xf32> to vector<8x8xf32>
    %22 = vector.shape_cast %21 : vector<8x8xf32> to vector<1x8x8xf32>
    %23 = vector.extract_strided_slice %6 {offsets = [0, 40], sizes = [8, 8], strides = [1, 1]} : vector<8x96xf32> to vector<8x8xf32>
    %24 = vector.shape_cast %23 : vector<8x8xf32> to vector<1x8x8xf32>
    %25 = vector.extract_strided_slice %6 {offsets = [0, 48], sizes = [8, 8], strides = [1, 1]} : vector<8x96xf32> to vector<8x8xf32>
    %26 = vector.shape_cast %25 : vector<8x8xf32> to vector<1x8x8xf32>
    %27 = vector.extract_strided_slice %6 {offsets = [0, 56], sizes = [8, 8], strides = [1, 1]} : vector<8x96xf32> to vector<8x8xf32>
    %28 = vector.shape_cast %27 : vector<8x8xf32> to vector<1x8x8xf32>
    %29 = vector.shape_cast %22 : vector<1x8x8xf32> to vector<1x1x8x8xf32>
    %30 = vector.shape_cast %24 : vector<1x8x8xf32> to vector<1x1x8x8xf32>
    %31 = vector.shape_cast %26 : vector<1x8x8xf32> to vector<1x1x8x8xf32>
    %32 = vector.shape_cast %28 : vector<1x8x8xf32> to vector<1x1x8x8xf32>
    %33 = tpu.concatenate %29, %30, %31, %32 in 0 : vector<1x1x8x8xf32>, vector<1x1x8x8xf32>, vector<1x1x8x8xf32>, vector<1x1x8x8xf32> -> vector<4x1x8x8xf32>
    %34 = vector.shape_cast %33 : vector<4x1x8x8xf32> to vector<4x8x8xf32>
    %35 = vector.extract_strided_slice %6 {offsets = [0, 64], sizes = [8, 8], strides = [1, 1]} : vector<8x96xf32> to vector<8x8xf32>
    %36 = vector.shape_cast %35 : vector<8x8xf32> to vector<1x8x8xf32>
    %37 = vector.extract_strided_slice %6 {offsets = [0, 72], sizes = [8, 8], strides = [1, 1]} : vector<8x96xf32> to vector<8x8xf32>
    %38 = vector.shape_cast %37 : vector<8x8xf32> to vector<1x8x8xf32>
    %39 = vector.extract_strided_slice %6 {offsets = [0, 80], sizes = [8, 8], strides = [1, 1]} : vector<8x96xf32> to vector<8x8xf32>
    %40 = vector.shape_cast %39 : vector<8x8xf32> to vector<1x8x8xf32>
    %41 = vector.extract_strided_slice %6 {offsets = [0, 88], sizes = [8, 8], strides = [1, 1]} : vector<8x96xf32> to vector<8x8xf32>
    %42 = vector.shape_cast %41 : vector<8x8xf32> to vector<1x8x8xf32>
    %43 = vector.shape_cast %36 : vector<1x8x8xf32> to vector<1x1x8x8xf32>
    %44 = vector.shape_cast %38 : vector<1x8x8xf32> to vector<1x1x8x8xf32>
    %45 = vector.shape_cast %40 : vector<1x8x8xf32> to vector<1x1x8x8xf32>
    %46 = vector.shape_cast %42 : vector<1x8x8xf32> to vector<1x1x8x8xf32>
    %47 = tpu.concatenate %43, %44, %45, %46 in 0 : vector<1x1x8x8xf32>, vector<1x1x8x8xf32>, vector<1x1x8x8xf32>, vector<1x1x8x8xf32> -> vector<4x1x8x8xf32>
    %48 = vector.shape_cast %47 : vector<4x1x8x8xf32> to vector<4x8x8xf32>
    "tpu.trace_start"() <{level = 10 : i32, message = "bqd,bkd->bqk"}> : () -> ()
    %cst_6 = arith.constant dense<0.000000e+00> : vector<4x8x8xf32>
    %49 = tpu.matmul %20, %34, %cst_6 {dimension_numbers = #tpu.dot_dimension_numbers<[2], [2], [1], [1], [0, 0, 0, 1, 1, 1], [0], [0]>} : vector<4x8x8xf32>, vector<4x8x8xf32>, vector<4x8x8xf32> -> vector<4x8x8xf32>
    "tpu.trace_stop"() : () -> ()
    %cst_7 = arith.constant dense<0xFF800000> : vector<4x8xf32>
    %50 = vector.multi_reduction <maximumf>, %49, %cst_7 [2] : vector<4x8x8xf32> to vector<4x8xf32>
    %51 = vector.shape_cast %50 : vector<4x8xf32> to vector<4x8x1xf32>
    %52 = vector.broadcast %51 : vector<4x8x1xf32> to vector<4x8x8xf32>
    %53 = arith.subf %49, %52 : vector<4x8x8xf32>
    %54 = math.exp %53 : vector<4x8x8xf32>
    %cst_8 = arith.constant dense<0.000000e+00> : vector<4x8xf32>
    %55 = vector.multi_reduction <add>, %54, %cst_8 [2] : vector<4x8x8xf32> to vector<4x8xf32>
    %56 = vector.shape_cast %55 : vector<4x8xf32> to vector<4x8x1xf32>
    "tpu.trace_start"() <{level = 10 : i32, message = "bqk,bkd->bqd"}> : () -> ()
    %cst_9 = arith.constant dense<0.000000e+00> : vector<4x8x8xf32>
    %57 = tpu.matmul %54, %48, %cst_9 {dimension_numbers = #tpu.dot_dimension_numbers<[2], [1], [1], [2], [0, 0, 0, 1, 1, 2], [0], [0]>} : vector<4x8x8xf32>, vector<4x8x8xf32>, vector<4x8x8xf32> -> vector<4x8x8xf32>
    "tpu.trace_stop"() : () -> ()
    %58 = tpu.reciprocal %56 : vector<4x8x1xf32> -> vector<4x8x1xf32>
    %59 = vector.broadcast %58 : vector<4x8x1xf32> to vector<4x8x8xf32>
    %60 = arith.mulf %57, %59 : vector<4x8x8xf32>
    %61 = vector.shape_cast %60 : vector<4x8x8xf32> to vector<4x1x8x8xf32>
    %62 = vector.extract_strided_slice %61 {offsets = [0, 0, 0, 0], sizes = [1, 1, 8, 8], strides = [1, 1, 1, 1]} : vector<4x1x8x8xf32> to vector<1x1x8x8xf32>
    %63 = vector.shape_cast %62 : vector<1x1x8x8xf32> to vector<1x8x8xf32>
    %64 = vector.extract_strided_slice %61 {offsets = [1, 0, 0, 0], sizes = [1, 1, 8, 8], strides = [1, 1, 1, 1]} : vector<4x1x8x8xf32> to vector<1x1x8x8xf32>
    %65 = vector.shape_cast %64 : vector<1x1x8x8xf32> to vector<1x8x8xf32>
    %66 = vector.extract_strided_slice %61 {offsets = [2, 0, 0, 0], sizes = [1, 1, 8, 8], strides = [1, 1, 1, 1]} : vector<4x1x8x8xf32> to vector<1x1x8x8xf32>
    %67 = vector.shape_cast %66 : vector<1x1x8x8xf32> to vector<1x8x8xf32>
    %68 = vector.extract_strided_slice %61 {offsets = [3, 0, 0, 0], sizes = [1, 1, 8, 8], strides = [1, 1, 1, 1]} : vector<4x1x8x8xf32> to vector<1x1x8x8xf32>
    %69 = vector.shape_cast %68 : vector<1x1x8x8xf32> to vector<1x8x8xf32>
    %cst_10 = arith.constant 0.000000e+00 : f32
    %70 = vector.broadcast %cst_10 : f32 to vector<1x8x96xf32>
    %71 = tpu.concatenate %63, %65, %67, %69, %70 in 2 : vector<1x8x8xf32>, vector<1x8x8xf32>, vector<1x8x8xf32>, vector<1x8x8xf32>, vector<1x8x96xf32> -> vector<1x8x128xf32>
    %72 = vector.shape_cast %71 : vector<1x8x128xf32> to vector<8x128xf32>
    %c0_11 = arith.constant 0 : index
    %c0_12 = arith.constant 0 : index
    %73 = vector.load %arg4[%c0_11, %c0_12] : memref<128x128xf32, #tpu.memory_space<vmem>>, vector<128x128xf32>
    %cst_13 = arith.constant dense<0.000000e+00> : vector<8x128xf32>
    %74 = tpu.matmul %72, %73, %cst_13 {dimension_numbers = #tpu.dot_dimension_numbers<[1], [0], [0], [1], [0, 0, 1, 1], [], []>} : vector<8x128xf32>, vector<128x128xf32>, vector<8x128xf32> -> vector<8x128xf32>
    %c0_14 = arith.constant 0 : index
    %c0_15 = arith.constant 0 : index
    %75 = vector.load %arg5[%c0_14, %c0_15] : memref<1x128xf32, #tpu.memory_space<vmem>>, vector<1x128xf32>
    %76 = vector.broadcast %75 : vector<1x128xf32> to vector<8x128xf32>
    %77 = arith.addf %74, %76 : vector<8x128xf32>
    %78 = vector.shape_cast %77 : vector<8x128xf32> to vector<1x8x128xf32>
    %c0_16 = arith.constant 0 : index
    %c0_17 = arith.constant 0 : index
    %c0_18 = arith.constant 0 : index
    %79 = vector.load %arg6[%c0_16, %c0_17, %c0_18] : memref<1x8x128xf32, #tpu.memory_space<vmem>>, vector<1x8x128xf32>
    tpu.vector_store %arg6[%c0_16, %c0_17, %c0_18], %78 {strides = array<i32>} : memref<1x8x128xf32, #tpu.memory_space<vmem>>, vector<1x8x128xf32>,
    return
  }
  func.func @transform_0(%arg0: i32) -> (i32, i32, i32) {
    %c0_i32 = arith.constant 0 : i32
    %c0_i32_0 = arith.constant 0 : i32
    %c0_i32_1 = arith.constant 0 : i32
    return %arg0, %c0_i32, %c0_i32_0 : i32, i32, i32
  }
  func.func @transform_1(%arg0: i32) -> (i32, i32) {
    %c0_i32 = arith.constant 0 : i32
    %c0_i32_0 = arith.constant 0 : i32
    %c0_i32_1 = arith.constant 0 : i32
    return %c0_i32, %c0_i32_0 : i32, i32
  }
  func.func @transform_2(%arg0: i32) -> (i32, i32) {
    %c0_i32 = arith.constant 0 : i32
    %c0_i32_0 = arith.constant 0 : i32
    %c0_i32_1 = arith.constant 0 : i32
    return %c0_i32, %c0_i32_0 : i32, i32
  }
  func.func @transform_3(%arg0: i32) -> (i32, i32) {
    %c0_i32 = arith.constant 0 : i32
    %c0_i32_0 = arith.constant 0 : i32
    %c0_i32_1 = arith.constant 0 : i32
    return %c0_i32, %c0_i32_0 : i32, i32
  }
  func.func @transform_4(%arg0: i32) -> (i32, i32) {
    %c0_i32 = arith.constant 0 : i32
    %c0_i32_0 = arith.constant 0 : i32
    %c0_i32_1 = arith.constant 0 : i32
    return %c0_i32, %c0_i32_0 : i32, i32
  }
  func.func @transform_5(%arg0: i32) -> (i32, i32, i32) {
    %c0_i32 = arith.constant 0 : i32
    %c0_i32_0 = arith.constant 0 : i32
    %c0_i32_1 = arith.constant 0 : i32
    return %arg0, %c0_i32, %c0_i32_0 : i32, i32, i32
  }
}

</mosaic_0001>

<bundles_post_ra>
// kernel: tpu_custom_call.1
= control target key start
LH: loop header
LB: loop body
LE: loop exit
PB: predicated region body
PF: predicated region fallthrough
CT: control target
= control target key end

     0   :  { %10 = vsyncpa [#allocation3], 0  ;;  %s1117_s0 = inlined_call_operand.vmem [shape: f32[2,8,128], index: 0, kind: input, shape index: {}]   ;;  %s1118_s1 = inlined_call_operand.vmem [shape: f32[128,96], index: 1, kind: input, shape index: {}]   ;;  %s1119_s2 = inlined_call_operand.vmem [shape: f32[1,96], index: 2, kind: input, shape index: {}]   ;;  %s1120_s3 = inlined_call_operand.vmem [shape: f32[128,128], index: 3, kind: input, shape index: {}]   ;;  %s1121_s4 = inlined_call_operand.vmem [shape: f32[1,128], index: 4, kind: input, shape index: {}]   ;;  %s1122_s5 = inlined_call_operand.hbm [shape: f32[2,8,128], index: 5, kind: output, shape index: {}]  }
   0x1   :  { %12 = vsyncpa [#allocation3 + $0x1], 0  ;;  %s903_s18 = smov 0   ;;  %s905_s19 = smov 0  }
   0x2   :  { %s907_s20 = smov 0   ;;  %s909_s21 = smov 0  }
   0x3 LB: > { %s924_s22 = sadd.s32 4294967295, %s863_s21   ;;  %s708_s23 = sadd.s32 4294967294, %s863_s21   ;;  %s863_s21 = sphi %s909_s21, %s1128_s21   ;;  %s859_s20 = sphi %s907_s20, %s1127_s20   ;;  %s855_s19 = sphi %s905_s19, %s1126_s19   ;;  %s851_s18 = sphi %s903_s18, %s1125_s18  }
   0x4   : > { %s928_s24 = sadd.s32 1, %s863_s21   ;;  %s135_s25 = sadd.s32 1, %s859_s20 }
   0x5   : > { %s132_s26 = ssub.s32 %s863_s21, %s928_s24  ;;  %p145_p0 = scmp.ne.s32.totalorder %s859_s20, %s855_s19 }
   0x6   : > { %p133_p1 = scmp.eq.s32.totalorder %s132_s26, 0  ;;  %p146_p2 = scmp.eq.s32.totalorder %s924_s22, 1 }
   0x7   : > { %p151_p3 = scmp.ne.s32.totalorder %s855_s19, %s851_s18  ;;  %p152_p4 = scmp.eq.s32.totalorder %s708_s23, 1 }
   0x8   : > { %s939_s27 = scalar_select %p133_p1, %s859_s20, %s135_s25  }
   0x9   : > { %p941_p5 = por %p146_p2, %p145_p0  ;;  %p945_p6 = por %p152_p4, %p151_p3 }
   0xa   : > { %p711_p7 = scmp.ge.s32.totalorder %s863_s21, 1  ;;  %p189_p8 = scmp.lt.s32.totalorder %s863_s21, 3 }
   0xc   : > { %p190_p9 = pnand %p711_p7, %p189_p8 }
   0xd   : > { %p216_p10 = scmp.lt.s32.totalorder (!%p190_p9), %s924_s22, 1  ;;  %s865_s12 = smov (!%p190_p9), 104  }
   0xe   : > { %193 = sbr.rel (%p190_p9) target bundleno = 1061 (0x425), region = 40  ;;  %s866_s13 = smov (!%p190_p9), 120  }
   0xf   : > { %s867_s14 = smov (!%p190_p9), 96   ;;  %s868_s15 = smov (!%p190_p9), 112  }
  0x10   : > { %s872_s17 = smov (!%p190_p9), 24   ;;  %s213_s26 = sand.u32 (!%p190_p9), 1, %s855_s19  }
  0x11   : > { %s712_s30 = sshll.u32 (!%p190_p9), %s213_s26, 3  ;;  %s728_s6 = sshll.u32 (!%p190_p9), %s924_s22, 3 }
  0x12   : > { %s644_s9 = scalar_lea.hbm (!%p190_p9), %s1122_s5, %s728_s6  ;;  %s821_s25 = scalar_lea.hbm (!%p190_p9), %s1122_s5, 16 }
  0x13   : > { %v236_v0 = vld [vmem:[%s1118_s1 + $0x78] sm:$0xff]  ;;  %v235_v1 = vld [vmem:[%s1118_s1 + $0x70] sm:$0xff]  ;;  %v234_v2 = vld [vmem:[%s1118_s1 + $0x68] sm:$0xff]  ;;  %s217_s11 = scalar_select %p216_p10, %s924_s22, 1  ;;  %vm270_vm0 = vcmask 64512  }
  0x14   : > { %241 = vmatpush.msra.mxu0 %v236_v0  ;;  %v233_v3 = vld [vmem:[%s1118_s1 + $0x60] sm:$0xff]  ;;  %v232_v4 = vld [vmem:[%s1118_s1 + $0x58] sm:$0xff]  ;;  %v231_v5 = vld [vmem:[%s1118_s1 + $0x50] sm:$0xff] }
  0x15   : > { %v230_v6 = vld [vmem:[%s1118_s1 + $0x48] sm:$0xff]  ;;  %v229_v7 = vld [vmem:[%s1118_s1 + $0x40] sm:$0xff]  ;;  %v228_v8 = vld [vmem:[%s1118_s1 + $0x38] sm:$0xff]  ;;  %s713_s16 = sshll.u32 %s217_s11, 3 }
  0x16   : > { %242 = vmatpush.msra.mxu0 %v235_v1  ;;  %v227_v9 = vld [vmem:[%s1118_s1 + $0x30] sm:$0xff]  ;;  %v226_v10 = vld [vmem:[%s1118_s1 + $0x28] sm:$0xff]  ;;  %v225_v11 = vld [vmem:[%s1118_s1 + $0x20] sm:$0xff]  ;;  %s219_s7 = scalar_lea.vmem %s1117_s0, %s713_s16  ;;  %s869_s16 = smov 64  }
  0x17   : > { %v224_v12 = vld [vmem:[%s1118_s1 + $0x18] sm:$0xff]  ;;  %v223_v13 = vld [vmem:[%s1118_s1 + $0x10] sm:$0xff]  ;;  %v222_v14 = vld [vmem:[%s1118_s1 + $0x8] sm:$0xff] }
  0x18   : > { %243 = vmatpush.msra.mxu0 %v234_v2  ;;  %v221_v15 = vld [vmem:[%s1118_s1] sm:$0xff]  ;;  %v607_v1 = vld [vmem:[%s1120_s3 + $0x78] sm:$0xff]  ;;  %v606_v2 = vld [vmem:[%s1120_s3 + $0x70] sm:$0xff] }
  0x19   : > { %v220_v16 = vld [vmem:[%s219_s7] sm:$0xff]  ;;  %612 = vmatpush.msra.mxu3 %v607_v1 }
  0x1a   : > { %244 = vmatpush.msra.mxu0 %v233_v3  ;;  %v783_v17 = vld [vmem:[%s1119_s2] ss:$0 sm:$0xff]  ;;  %v605_v3 = vld [vmem:[%s1120_s3 + $0x68] sm:$0xff] }
  0x1b   : > { %613 = vmatpush.msra.mxu3 %v606_v2 }
  0x1c   : > { %245 = vmatpush.msra.mxu0 %v232_v4 }
  0x1d   : > { %614 = vmatpush.msra.mxu3 %v605_v3 }
  0x1e   : > { %246 = vmatpush.msra.mxu0 %v231_v5 }
  0x20   : > { %247 = vmatpush.msra.mxu0 %v230_v6 }
  0x22   : > { %248 = vmatpush.msra.mxu0 %v229_v7  ;;  %v604_v7 = vld [vmem:[%s1120_s3 + $0x60] sm:$0xff] }
  0x23   : > { %615 = vmatpush.msra.mxu3 %v604_v7  ;;  %v784_v7 = vld [vmem:[%s1121_s4] ss:$0 sm:$0xff] }
  0x24   : > { %249 = vmatpush.msra.mxu0 %v228_v8 }
  0x26   : > { %250 = vmatpush.msra.mxu0 %v227_v9 }
  0x28   : > { %251 = vmatpush.msra.mxu0 %v226_v10  ;;  %v603_v10 = vld [vmem:[%s1120_s3 + $0x58] sm:$0xff] }
  0x29   : > { %616 = vmatpush.msra.mxu3 %v603_v10 }
  0x2a   : > { %252 = vmatpush.msra.mxu0 %v225_v11 }
  0x2c   : > { %253 = vmatpush.msra.mxu0 %v224_v12 }
  0x2e   : > { %254 = vmatpush.msra.mxu0 %v223_v13 }
  0x30   : > { %255 = vmatpush.msra.mxu0 %v222_v14 }
  0x32   : > { %256 = vmatpush.msra.mxu0 %v221_v15  ;;  %v602_v15 = vld [vmem:[%s1120_s3 + $0x50] sm:$0xff] }
  0x33   : > { %257 = vmatmul.f32.vlgmr.msra.gmra.mxu0 %v220_v16  ;;  %617 = vmatpush.msra.mxu3 %v602_v15 }
  0xb0   : > { %v258_v18 = vpop.f32.mrf.mxu0 }
  0xb1   : > { %v259_v19 = vadd.f32 %v783_v17, %v258_v18  ;;  %v601_v17 = vld [vmem:[%s1120_s3 + $0x48] sm:$0xff] }
  0xb2   : > { %618 = vmatpush.msra.mxu3 %v601_v17 }
  0xb3   : > { %266 = vrot.lane.b32.xlu1 %v259_v19, %s865_s12  ;;  %262 = vrot.lane.b32.xlu0 %v259_v19, %s866_s13  ;;  %s215_s12 = scalar_lea.vmem [#allocation2], %s712_s30 }
  0xb4   : > { %s646_s13 = sshll.u32 %s215_s12, 4  ;;  %s647_s13 = int_to_ptr.vmem [resolvable:$true] %s646_s13 }
  0xbb   : > { %268 = vrot.lane.b32.xlu1 %v259_v19, %s867_s14  ;;  %264 = vrot.lane.b32.xlu0 %v259_v19, %s868_s15  ;;  %s870_s15 = smov 16  }
 0x125   : > { %v267_v20 = vpop.permute.xlu1 %266  ;;  %v263_v21 = vpop.permute.xlu0 %262 }
 0x126   : > { %347 = vrot.lane.b32.xlu0 %v267_v20, %s867_s14  ;;  %295 = vrot.lane.b32.xlu2 %v263_v21, %s867_s14  ;;  %v778_v22 = vpack.i.bf16 %v263_v21, %v259_v19 }
 0x12d   : > { %v269_v23 = vpop.permute.xlu1 %268  ;;  %v265_v24 = vpop.permute.xlu0 %264 }
 0x12e   : > { %714 = vmatpush.xpose.msk.msra.mxu1 %vm270_vm0, %v269_v23  ;;  %779 = vrot.lane.b32.xlu0 %v778_v22, %s869_s16 }
 0x12f   : > { %321 = vrot.lane.b32.xlu2 %v265_v24, %s867_s14  ;;  %s648_s14 = sshll.u32 %s644_s9, 4  ;;  %s649_s14 = int_to_ptr.hbm [resolvable:$true] %s648_s14 }
 0x131   : > { %715 = vmatmul.msk.f32.vlgmr.msra.gmra.mxu1 %vm270_vm0, %v259_v19 }
 0x180   : > { %v296_v25 = vpop.permute.xlu2 %295 }
 0x181   : > { %716 = vmatpush.xpose.msk.msra.mxu2 %vm270_vm0, %v296_v25 }
 0x184   : > { %717 = vmatmul.msk.f32.vlgmr.msra.gmra.mxu2 %vm270_vm0, %v263_v21 }
 0x189   : > { %v322_v26 = vpop.permute.xlu2 %321 }
 0x18a   : > { %718 = vmatpush.xpose.msk.msrb.mxu1 %vm270_vm0, %v322_v26 }
 0x18d   : > { %719 = vmatmul.msk.f32.vlgmr.msrb.gmra.mxu1 %vm270_vm0, %v265_v24 }
 0x198   : > { %v348_v27 = vpop.permute.xlu0 %347 }
 0x199   : > { %720 = vmatpush.xpose.msk.msra.mxu1 %vm270_vm0, %v348_v27 }
 0x19c   : > { %721 = vmatmul.msk.f32.vlgmr.msra.gmra.mxu1 %vm270_vm0, %v267_v20 }
 0x1a0   : > { %v780_v28 = vpop.permute.xlu0 %779 }
 0x1a1   : > { %v782_v29 = vunpack.i.h.bf16 %v780_v28  ;;  %v781_v30 = vunpack.i.l.bf16 %v780_v28 }
 0x1a3   : > { %430 = vmatpush.msrb.mxu2 %v781_v30 }
 0x1a5   : > { %456 = vmatpush.msra.mxu2 %v782_v29 }
 0x1ae   : > { %v292_v31 = vpop.f32.mrf.mxu1 }
 0x1af   : > { %v373_v32 = vsel %vm270_vm0, %v292_v31, -inf }
 0x1b0   : > { %374 = vmax.xlane.f32.xlu1 %v373_v32 }
 0x1c9   : > { %487 = vrot.lane.b32.xlu1 %v267_v20, %s869_s16 }
 0x207   : > { %v318_v33 = vpop.f32.mrf.mxu2 }
 0x208   : > { %v376_v34 = vsel %vm270_vm0, %v318_v33, -inf }
 0x209   : > { %377 = vmax.xlane.f32.xlu2 %v376_v34 }
 0x20a   : > { %v344_v35 = vpop.f32.mrf.mxu1 }
 0x20b   : > { %v379_v36 = vsel %vm270_vm0, %v344_v35, -inf }
 0x211   : > { %380 = vmax.xlane.f32.xlu2 %v379_v36 }
 0x219   : > { %v370_v37 = vpop.f32.mrf.mxu1 }
 0x21a   : > { %v382_v38 = vsel %vm270_vm0, %v370_v37, -inf }
 0x21b   : > { %383 = vmax.xlane.f32.xlu0 %v382_v38 }
 0x223   : > { %v375_v39 = vpop.xlane.xlu1 %374 }
 0x224   : > { %v385_v40 = vsub.f32 %v292_v31, %v375_v39 }
 0x226   : > { %v389_v41 = vmul.f32 1.442695, %v385_v40 }
 0x228   : > { %785 = vpow2.f32 %v389_v41 }
 0x229   : > { %461 = vrot.lane.b32.xlu2 %v265_v24, %s869_s16  ;;  %s871_s16 = smov 8  }
 0x22e   : > { %v786_v42 = vpop.eup %785 }
 0x22f   : > { %722 = vmatmul.msk.f32.vlgmr.msrb.gmra.mxu2 %vm270_vm0, %v786_v42  ;;  %v397_v44 = vsel %vm270_vm0, %v786_v42, 0.0 }
 0x23b   : > { %v488_v43 = vpop.permute.xlu1 %487 }
 0x23c   : > { %508 = vmatpush.msrb.mxu2 %v488_v43 }
 0x252   : > { %398 = vadd.xlane.f32.xlu2 %v397_v44  ;;  %v600_v44 = vld [vmem:[%s1120_s3 + $0x40] sm:$0xff] }
 0x253   : > { %619 = vmatpush.msra.mxu3 %v600_v44 }
 0x27c   : > { %v378_v45 = vpop.xlane.xlu2 %377 }
 0x27d   : > { %v386_v46 = vsub.f32 %v318_v33, %v378_v45  ;;  %v599_v45 = vld [vmem:[%s1120_s3 + $0x38] sm:$0xff] }
 0x27e   : > { %620 = vmatpush.msra.mxu3 %v599_v45 }
 0x27f   : > { %v391_v47 = vmul.f32 1.442695, %v386_v46  ;;  %v598_v46 = vld [vmem:[%s1120_s3 + $0x30] sm:$0xff] }
 0x280   : > { %621 = vmatpush.msra.mxu3 %v598_v46 }
 0x281   : > { %787 = vpow2.f32 %v391_v47  ;;  %v597_v47 = vld [vmem:[%s1120_s3 + $0x28] sm:$0xff] }
 0x282   : > { %622 = vmatpush.msra.mxu3 %v597_v47 }
 0x284   : > { %v381_v48 = vpop.xlane.xlu2 %380 }
 0x285   : > { %v387_v49 = vsub.f32 %v344_v35, %v381_v48 }
 0x287   : > { %v788_v50 = vpop.eup %787  ;;  %v393_v51 = vmul.f32 1.442695, %v387_v49  ;;  %v596_v49 = vld [vmem:[%s1120_s3 + $0x20] sm:$0xff] }
 0x288   : > { %723 = vmatmul.msk.f32.vlgmr.msra.gmra.mxu2 %vm270_vm0, %v788_v50  ;;  %v400_v52 = vsel %vm270_vm0, %v788_v50, 0.0  ;;  %v595_v50 = vld [vmem:[%s1120_s3 + $0x18] sm:$0xff]  ;;  %623 = vmatpush.msra.mxu3 %v596_v49 }
 0x289   : > { %789 = vpow2.f32 %v393_v51  ;;  %401 = vadd.xlane.f32.xlu0 %v400_v52  ;;  %v594_v51 = vld [vmem:[%s1120_s3 + $0x10] sm:$0xff]  ;;  %v593_v52 = vld [vmem:[%s1120_s3 + $0x8] sm:$0xff] }
 0x28a   : > { %624 = vmatpush.msra.mxu3 %v595_v50 }
 0x28c   : > { %v462_v53 = vpop.permute.xlu2 %461  ;;  %625 = vmatpush.msra.mxu3 %v594_v51 }
 0x28d   : > { %482 = vmatpush.msrb.mxu1 %v462_v53  ;;  %v592_v53 = vld [vmem:[%s1120_s3] sm:$0xff] }
 0x28e   : > { %v384_v54 = vpop.xlane.xlu0 %383  ;;  %626 = vmatpush.msra.mxu3 %v593_v52 }
 0x28f   : > { %v790_v55 = vpop.eup %789  ;;  %v388_v56 = vsub.f32 %v370_v37, %v384_v54 }
 0x290   : > { %724 = vmatmul.msk.f32.vlgmr.msrb.gmra.mxu1 %vm270_vm0, %v790_v55  ;;  %v403_v57 = vsel %vm270_vm0, %v790_v55, 0.0  ;;  %627 = vmatpush.msra.mxu3 %v592_v53 }
 0x291   : > { %v395_v58 = vmul.f32 1.442695, %v388_v56  ;;  %404 = vadd.xlane.f32.xlu0 %v403_v57 }
 0x293   : > { %791 = vpow2.f32 %v395_v58 }
 0x299   : > { %v792_v59 = vpop.eup %791 }
 0x29a   : > { %725 = vmatmul.msk.f32.vlgmr.msrb.gmra.mxu2 %vm270_vm0, %v792_v59  ;;  %v406_v60 = vsel %vm270_vm0, %v792_v59, 0.0 }
 0x29b   : > { %407 = vadd.xlane.f32.xlu1 %v406_v60 }
 0x2b2   : > { %v1051_v22 = vpop.f32.mrf.mxu2 }
 0x2c5   : > { %v399_v48 = vpop.xlane.xlu2 %398 }
 0x2c6   : > { %v524_v60 = vand.u32 2147483648, %v399_v48  ;;  %vm518_vm14 = vweird.f32 %v399_v48 }
 0x2fc   : > { %v402_v61 = vpop.xlane.xlu0 %401 }
 0x2fd   : > { %793 = vrcp.f32 %v402_v61  ;;  %v538_v23 = vand.u32 2147483648, %v402_v61  ;;  %vm532_vm6 = vweird.f32 %v402_v61  ;;  %v536_v26 = vand.u32 2147483647, %v402_v61 }
 0x2ff   : > { %v539_v31 = vor.u32 1.1754944e-38, %v538_v23  ;;  %vm537_vm8 = vcmp.eq.f32.partialorder %v536_v26, 8.507059e+37 }
 0x303   : > { %v794_v63 = vpop.eup %793 }
 0x304   : > { %v405_v62 = vpop.xlane.xlu0 %404  ;;  %v528_v0 = vmul.f32 %v794_v63, %v402_v61  ;;  %vm533_vm4 = vweird.f32 %v794_v63  ;;  %v522_v61 = vand.u32 2147483647, %v399_v48 }
 0x305   : > { %795 = vrcp.f32 %v405_v62  ;;  %v552_v11 = vand.u32 2147483648, %v405_v62  ;;  %v550_v14 = vand.u32 2147483647, %v405_v62  ;;  %vm546_vm2 = vweird.f32 %v405_v62  ;;  %vm534_vm7 = vmor %vm532_vm6, %vm533_vm4 }
 0x306   : > { %v529_v5 = vsub.f32 1.0, %v528_v0  ;;  %vm590_vm4 = vcmask 261120  }
 0x307   : > { %v553_v18 = vor.u32 1.1754944e-38, %v552_v11  ;;  %vm551_vm5 = vcmp.eq.f32.partialorder %v550_v14, 8.507059e+37 }
 0x308   : > { %v530_v12 = vmul.f32 %v794_v63, %v529_v5 }
 0x30a   : > { %v531_v19 = vadd.f32 %v794_v63, %v530_v12 }
 0x30b   : > { %v796_v4 = vpop.eup %795  ;;  %v458_v35 = vpop.f32.mrf.mxu2 }
 0x30c   : > { %v542_v6 = vmul.f32 %v796_v4, %v405_v62  ;;  %vm547_vm1 = vweird.f32 %v796_v4  ;;  %v535_v29 = vsel %vm534_vm7, %v794_v63, %v531_v19  ;;  %v525_v63 = vor.u32 1.1754944e-38, %v524_v60 }
 0x30d   : > { %vm548_vm3 = vmor %vm546_vm2, %vm547_vm1  ;;  %v484_v24 = vpop.f32.mrf.mxu1  ;;  %v540_v33 = vsel %vm537_vm8, %v539_v31, %v535_v29  ;;  %vm523_vm1 = vcmp.eq.f32.partialorder %v522_v61, 8.507059e+37  ;;  %vm586_vm2 = vcmask 130048  }
 0x30e   : > { %v543_v8 = vsub.f32 1.0, %v542_v6  ;;  %v408_v9 = vpop.xlane.xlu1 %407  ;;  %v570_v37 = vmul.f32 %v540_v33, %v458_v35 }
 0x30f   : > { %797 = vrcp.f32 %v408_v9  ;;  %v566_v36 = vand.u32 2147483648, %v408_v9  ;;  %vm560_vm10 = vweird.f32 %v408_v9  ;;  %v564_v38 = vand.u32 2147483647, %v408_v9 }
 0x310   : > { %v544_v13 = vmul.f32 %v796_v4, %v543_v8  ;;  %799 = vrcp.f32 %v399_v48 }
 0x311   : > { %v567_v40 = vor.u32 1.1754944e-38, %v566_v36  ;;  %vm565_vm12 = vcmp.eq.f32.partialorder %v564_v38, 8.507059e+37 }
 0x312   : > { %v545_v16 = vadd.f32 %v796_v4, %v544_v13 }
 0x314   : > { %v549_v20 = vsel %vm548_vm3, %v796_v4, %v545_v16  ;;  %vm588_vm3 = vcmask 195584  }
 0x315   : > { %v798_v21 = vpop.eup %797  ;;  %v554_v25 = vsel %vm551_vm5, %v553_v18, %v549_v20 }
 0x316   : > { %v571_v27 = vmul.f32 %v554_v25, %v484_v24  ;;  %v556_v28 = vmul.f32 %v798_v21, %v408_v9  ;;  %vm561_vm9 = vweird.f32 %v798_v21  ;;  %v800_v54 = vpop.eup %799 }
 0x317   : > { %vm562_vm11 = vmor %vm560_vm10, %vm561_vm9  ;;  %v514_v55 = vmul.f32 %v800_v54, %v399_v48  ;;  %vm519_vm13 = vweird.f32 %v800_v54 }
 0x318   : > { %v557_v30 = vsub.f32 1.0, %v556_v28  ;;  %578 = vrot.lane.b32.xlu0 %v571_v27, %s870_s15  ;;  %vm520_vm15 = vmor %vm518_vm14, %vm519_vm13  ;;  %s634_s15 = scalar_lea.sflag [#allocation3], %s213_s26 }
 0x319   : > { %v515_v56 = vsub.f32 1.0, %v514_v55 }
 0x31a   : > { %v558_v32 = vmul.f32 %v798_v21, %v557_v30 }
 0x31b   : > { %v516_v57 = vmul.f32 %v800_v54, %v515_v56 }
 0x31c   : > { %v559_v34 = vadd.f32 %v798_v21, %v558_v32 }
 0x31d   : > { %v510_v42 = vpop.f32.mrf.mxu2  ;;  %v517_v59 = vadd.f32 %v800_v54, %v516_v57 }
 0x31e   : > { %v563_v39 = vsel %vm562_vm11, %v798_v21, %v559_v34 }
 0x31f   : > { %v568_v41 = vsel %vm565_vm12, %v567_v40, %v563_v39  ;;  %v521_v62 = vsel %vm520_vm15, %v800_v54, %v517_v59 }
 0x320   : > { %574 = vrot.lane.b32.xlu0 %v570_v37, %s871_s16  ;;  %v572_v43 = vmul.f32 %v568_v41, %v510_v42  ;;  %v526_v1 = vsel %vm523_vm1, %v525_v63, %v521_v62  ;;  %s815_s16 = sshra.s32 %s649_s14, 4  ;;  %s816_s16 = int_to_ptr.hbm [resolvable:$true] %s815_s16 }
 0x321   : > { %v569_v2 = vmul.f32 %v526_v1, %v1051_v22  ;;  %s817_s22 = scalar_lea.hbm %s816_s16, 8  ;;  %p822_p0 = scmp.lt.s32.totalorder %s816_s16, %s1122_s5 }
 0x322   : > { %p818_p11 = scmp.ne.s32.totalorder %s816_s16, %s817_s22  ;;  %p823_p1 = scmp.lt.s32.totalorder %s821_s25, %s817_s22 }
 0x324   : > { %p819_p12 = pnand %p818_p11, %p941_p5  ;;  %p824_p2 = por %p823_p1, %p822_p0 }
 0x326   : > { %p820_p13 = pneg %p819_p12 }
 0x328   : > { %582 = vrot.lane.b32.xlu0 %v572_v43, %s872_s17  ;;  %p825_p3 = pnand %p824_p2, %p820_p13 }
 0x38a   : > { %v579_v58 = vpop.permute.xlu0 %578 }
 0x392   : > { %v575_v0 = vpop.permute.xlu0 %574 }
 0x393   : > { %v585_v3 = vsel %vm270_vm0, %v569_v2, %v575_v0 }
 0x394   : > { %v587_v5 = vsel %vm586_vm2, %v585_v3, %v579_v58 }
 0x39a   : > { %v583_v4 = vpop.permute.xlu0 %582 }
 0x39b   : > { %v589_v6 = vsel %vm588_vm3, %v587_v5, %v583_v4 }
 0x39c   : > { %726 = vmatmul.msk.f32.vlgmr.msra.gmra.mxu3 %vm590_vm4, %v589_v6 }
 0x41f   : > { %v629_v8 = vpop.f32.mrf.mxu3 }
 0x420   : > { %v630_v9 = vadd.f32 %v784_v7, %v629_v8 }
 0x422   : > { %632 = vst [vmem:[%s215_s12] sm:$0xff] %v630_v9 }
 0x423   : > { %828 = shalt.err (!%p825_p3)
}
 0x424   : > { %731 = dma.vmem_to_hbm [thread:$0]  (%p941_p5), %s647_s13, 128, %s649_s14, %s634_s15  }
 0x425 PF: > { %p737_p4 = scmp.ge.s32.totalorder %s863_s21, 2  ;;  %s660_s26 = sand.u32 1, %s851_s18  }
 0x426   : > { %s661_s7 = scalar_lea.sflag [#allocation3], %s660_s26 }
 0x427   : > { %p734_p7 = pnand %p737_p4, %p945_p6 }
 0x429   : > { %p735_p8 = pneg %p734_p7 }
 0x42b   : > { %846 = dma.done.wait (%p735_p8), %s661_s7, 128  }
 0x42c   : > { %848 = vsyncadd (%p735_p8), %s661_s7, 4294967168  ;;  %p15_p9 = scmp.ge.s32.totalorder %s928_s24, 4   ;;  %s1125_s18 = smov %s855_s19 }
 0x42d   : > { %s1126_s19 = smov %s859_s20  ;;  %s1127_s20 = smov %s939_s27 }
 0x42e   : > { %s1128_s21 = smov %s928_s24  ;;  %17 = sbr.rel (!%p15_p9) target bundleno = 3 (0x3), region = 75 }
 0x433   :  { %667 = vsyncpa [#allocation3], 1 }
 0x434   :  { %669 = vsyncpa [#allocation3 + $0x1], 1 }

</bundles_post_ra>
